<compile_context>
chip_gen: v5e
topology: v5e:2x2
jax: 0.10.0
libtpu: 0.0.40
codegen_flags: <defaults>
</compile_context>

<pallas_src>
import functools

import jax
import jax.numpy as jnp
from jax.experimental import pallas as pl
from jax.experimental.pallas import tpu as pltpu

SMOOTH_FACTOR = 0.1
IGNORE_INDEX = 255
_LANES = 128


def _soft_ce_kernel(logits_ref, labels_ref, out_ref, *,
                    num_classes, ignore_index, smooth_factor,
                    sub_rows, n_sub, rows_total, tile_rows, acc_rows):
    """One (batch, pixel-tile) grid step.

    logits_ref : (C, TP, 128)    logits; class dim leading, pixels lane-dense.
    labels_ref : (TP, 128) int16 target class per pixel.
    out_ref    : (acc_rows, 128) f32 per-tile partial loss (written once).
    """
    tile = pl.program_id(1)
    row0 = tile * tile_rows
    eps = smooth_factor

    def sub_chunk(s, acc):
        r = s * sub_rows
        if not isinstance(r, int):
            r = pl.multiple_of(r, sub_rows)

        t = labels_ref[pl.ds(r, sub_rows), :].astype(jnp.int32)       # (SR, 128)
        row_idx = (row0 + r
                   + jax.lax.broadcasted_iota(jnp.int32, (sub_rows, _LANES), 0))
        valid = (row_idx < rows_total) & (t != ignore_index)

        def load(ci):
            return logits_ref[ci, pl.ds(r, sub_rows), :].astype(jnp.float32)

        x0 = load(0)
        if num_classes <= 16:
            # fully unrolled over the small static class dim (pure VPU/EUP work)
            m = x0
            for ci in range(1, num_classes):
                m = jnp.maximum(m, load(ci))
            sum_exp = jnp.zeros_like(m)
            sum_x = jnp.zeros_like(m)
            tgt = jnp.zeros_like(m)
            for ci in range(num_classes):
                xr = load(ci)
                sum_exp = sum_exp + jnp.exp(xr - m)
                sum_x = sum_x + xr
                tgt = jnp.where(t == ci, xr, tgt)
        else:
            # large class counts: partially-unrolled loops, bounded code footprint
            m = jax.lax.fori_loop(1, num_classes,
                                  lambda ci, mm: jnp.maximum(mm, load(ci)),
                                  x0, unroll=4)

            def body(ci, carry):
                se, sx, tg = carry
                xr = load(ci)
                return (se + jnp.exp(xr - m), sx + xr,
                        jnp.where(t == ci, xr, tg))

            z = jnp.zeros_like(m)
            sum_exp, sum_x, tgt = jax.lax.fori_loop(0, num_classes, body,
                                                    (z, z, z), unroll=4)

        lse = jnp.log(sum_exp) + m
        # fused label-smoothed CE per pixel:
        #   (1-eps)*(lse - x_t) + (eps/C)*(C*lse - sum_x)
        #     = lse - (1-eps)*x_t - (eps/C)*sum_x
        loss = lse - (1.0 - eps) * tgt - (eps / num_classes) * sum_x
        loss = jnp.where(valid, loss, 0.0)

        # sublane-group reduce (SR,128) -> (acc_rows,128); pure VALU vreg adds
        part = jnp.sum(loss.reshape(sub_rows // acc_rows, acc_rows, _LANES), axis=0)
        return acc + part

    acc0 = jnp.zeros((acc_rows, _LANES), jnp.float32)
    if n_sub == 1:
        out_ref[...] = sub_chunk(0, acc0)
    else:
        out_ref[...] = jax.lax.fori_loop(0, n_sub, sub_chunk, acc0, unroll=2)


def _nearest_resize_nchw(label, out_hw):
    """F.interpolate(label, size=out_hw, mode='nearest') for NCHW input."""
    n, c, hl, wl = label.shape
    h, w = out_hw
    hi = (jnp.arange(h) * hl) // h
    wi = (jnp.arange(w) * wl) // w
    return label[:, :, hi[:, None], wi[None, :]]             # (N, C, H, W)


def seg_cross_entropy_loss(pred, label, *,
                           smooth_factor=SMOOTH_FACTOR,
                           ignore_index=IGNORE_INDEX,
                           logits_block_bytes=8 * 1024 * 1024):
    """pred: (N, C, H, W) float logits (NCHW). label: (N, 1, Hl, Wl) float/int."""
    n, c, h, w = pred.shape
    hw = h * w

    # ---- plain-JAX glue: nearest resize of labels to pred's spatial size ----
    gt = _nearest_resize_nchw(label.astype(jnp.float32), (h, w))
    gt = jnp.squeeze(gt, 1).astype(jnp.int32)                 # (N, H, W)

    rows_total = (hw + _LANES - 1) // _LANES
    hw128 = rows_total * _LANES

    # ---- labels: pad tail lanes with ignore_index (cheap), stream as int16 ----
    labels = gt.reshape(n, hw)
    if hw128 != hw:
        labels = jnp.pad(labels, ((0, 0), (0, hw128 - hw)),
                         constant_values=ignore_index)
    labels = labels.reshape(n, rows_total, _LANES).astype(jnp.int16)

    # ---- logits: keep NCHW, only a free reshape (no transpose, no tile pad) ----
    logits = pred.reshape(n, c, hw)
    if hw128 != hw:
        # TODO(synk): avoid this full copy (rare: hw % 128 != 0) by handling the
        # ragged last 128-lane group inside the kernel instead of padding.
        logits = jnp.pad(logits, ((0, 0), (0, 0), (0, hw128 - hw)))
    logits = logits.reshape(n, c, rows_total, _LANES)

    # ---- tile over pixel rows: ~8 MiB logits block, sub-chunked at 32 sublanes ----
    itemsize = pred.dtype.itemsize
    desired_rows = max(32, (logits_block_bytes // (c * _LANES * itemsize)) // 32 * 32)
    if rows_total >= 32:
        tp = min(desired_rows, (rows_total // 32) * 32)       # multiple of 32
        sub_rows = 32
    else:
        tp = rows_total                                       # tiny image fallback
        sub_rows = rows_total
    n_tiles = -(-rows_total // tp)                            # ragged tile masked in-kernel
    n_sub = tp // sub_rows
    acc_rows = 8 if sub_rows % 8 == 0 else sub_rows

    # ---- explicit VMEM budget (v5e default scoped is only 16 MiB; v7x has 64 MiB) ----
    logits_blk = c * tp * _LANES * itemsize
    labels_blk = tp * _LANES * labels.dtype.itemsize
    vmem_need = (2 * (logits_blk + labels_blk)
                 + 2 * acc_rows * _LANES * 4
                 + 8 * sub_rows * _LANES * 4
                 + (2 << 20))
    vmem_limit = int(min(48 << 20, max(32 << 20, vmem_need)))

    cost = pl.CostEstimate(
        flops=int(6 * n * c * hw128),
        transcendentals=int(n * (c + 1) * hw128),
        bytes_accessed=int(n * c * hw128 * itemsize
                           + n * hw128 * labels.dtype.itemsize
                           + n * n_tiles * acc_rows * _LANES * 4),
    )

    kernel = functools.partial(_soft_ce_kernel,
                               num_classes=c, ignore_index=ignore_index,
                               smooth_factor=smooth_factor,
                               sub_rows=sub_rows, n_sub=n_sub,
                               rows_total=rows_total, tile_rows=tp,
                               acc_rows=acc_rows)

    partials = pl.pallas_call(
        kernel,
        out_shape=jax.ShapeDtypeStruct((n, n_tiles, acc_rows, _LANES), jnp.float32),
        grid=(n, n_tiles),
        in_specs=[
            pl.BlockSpec((None, c, tp, _LANES), lambda b, i: (b, 0, i, 0)),
            pl.BlockSpec((None, tp, _LANES), lambda b, i: (b, i, 0)),
        ],
        out_specs=pl.BlockSpec((None, None, acc_rows, _LANES),
                               lambda b, i: (b, i, 0, 0)),
        compiler_params=pltpu.CompilerParams(
            dimension_semantics=("parallel", "parallel"),
            vmem_limit_bytes=vmem_limit),
        cost_estimate=cost,
    )(logits, labels)

    # smp mean divides by the total pixel count (ignored pixels counted as zeros)
    return jnp.sum(partials) / (n * h * w)


def _reference_loss(pred, label, smooth_factor=SMOOTH_FACTOR,
                    ignore_index=IGNORE_INDEX):
    """Pure-JAX reference mirroring smp SoftCrossEntropyLoss."""
    n, c, h, w = pred.shape
    gt = _nearest_resize_nchw(label.astype(jnp.float32), (h, w))
    gt = jnp.squeeze(gt, 1).astype(jnp.int32)
    lprobs = jax.nn.log_softmax(pred.astype(jnp.float32), axis=1)   # (N,C,H,W)
    valid = gt != ignore_index
    t_safe = jnp.where(valid, gt, 0)
    nll = -jnp.take_along_axis(lprobs, t_safe[:, None], axis=1)[:, 0]
    smooth = -jnp.sum(lprobs, axis=1)
    nll = jnp.where(valid, nll, 0.0)
    smooth = jnp.where(valid, smooth, 0.0)
    eps = smooth_factor
    return (1.0 - eps) * nll.mean() + (eps / c) * smooth.mean()


if __name__ == "__main__":
    key = jax.random.PRNGKey(0)
    k1, k2, k3 = jax.random.split(key, 3)

    N, C, H, W = 2, 4, 16, 16
    pred = jax.random.normal(k1, (N, C, H, W), dtype=jnp.float32)

    # label at a different spatial size to exercise nearest interpolation,
    # with a sprinkling of ignore_index (255) pixels
    Hl, Wl = 8, 8
    label = jax.random.randint(k2, (N, 1, Hl, Wl), 0, C)
    ignore_mask = jax.random.bernoulli(k3, 0.1, (N, 1, Hl, Wl))
    label = jnp.where(ignore_mask, IGNORE_INDEX, label).astype(jnp.float32)

    loss = seg_cross_entropy_loss(pred, label)
    loss = jax.block_until_ready(loss)

    ref = _reference_loss(pred, label)
    assert jnp.allclose(loss, ref, rtol=1e-5, atol=1e-5), (loss, ref)

    print("KERNEL_OK")
</pallas_src>

<mosaic_0001>
module attributes {stable_mosaic.version = 11 : i64} {
  func.func @_soft_ce_kernel(%arg0: i32, %arg1: i32, %arg2: memref<1x4x2x128xf32, #tpu.memory_space<vmem>>, %arg3: memref<1x2x128xi16, #tpu.memory_space<vmem>>, %arg4: memref<1x1x2x128xf32, #tpu.memory_space<vmem>>) attributes {dimension_semantics = [#tpu.dimension_semantics<parallel>, #tpu.dimension_semantics<parallel>], iteration_bounds = array<i64: 2, 1>, scalar_prefetch = 0 : i64, scratch_operands = 0 : i64, tpu.core_type = #tpu.core_type<tc>, window_params = [{transform_indices = @transform_0, window_bounds = array<i64: 1, 4, 2, 128>}, {transform_indices = @transform_1, window_bounds = array<i64: 1, 2, 128>}, {transform_indices = @transform_2, window_bounds = array<i64: 1, 1, 2, 128>}]} {
    %c2_i32 = arith.constant 2 : i32
    %0 = arith.muli %arg1, %c2_i32 : i32
    %cst = arith.constant 0.000000e+00 : f32
    %1 = vector.broadcast %cst : f32 to vector<2x128xf32>
    %c0 = arith.constant 0 : index
    %c0_0 = arith.constant 0 : index
    %c0_1 = arith.constant 0 : index
    %2 = vector.load %arg3[%c0, %c0_0, %c0_1] : memref<1x2x128xi16, #tpu.memory_space<vmem>>, vector<1x2x128xi16>
    %3 = vector.shape_cast %2 : vector<1x2x128xi16> to vector<2x128xi16>
    %4 = arith.extsi %3 : vector<2x128xi16> to vector<2x128xi32>
    %c0_i32 = arith.constant 0 : i32
    %5 = arith.addi %0, %c0_i32 : i32
    %6 = tpu.iota {dimensions = array<i32: 0>} : vector<2x128xi32>
    %7 = vector.broadcast %5 : i32 to vector<2x128xi32>
    %8 = arith.addi %7, %6 : vector<2x128xi32>
    %c2_i32_2 = arith.constant 2 : i32
    %9 = vector.broadcast %c2_i32_2 : i32 to vector<2x128xi32>
    %10 = arith.cmpi slt, %8, %9 : vector<2x128xi32>
    %c255_i32 = arith.constant 255 : i32
    %11 = vector.broadcast %c255_i32 : i32 to vector<2x128xi32>
    %12 = arith.cmpi ne, %4, %11 : vector<2x128xi32>
    %13 = arith.andi %10, %12 : vector<2x128xi1>
    %c0_3 = arith.constant 0 : index
    %c0_4 = arith.constant 0 : index
    %c0_5 = arith.constant 0 : index
    %c0_6 = arith.constant 0 : index
    %14 = vector.load %arg2[%c0_3, %c0_4, %c0_5, %c0_6] : memref<1x4x2x128xf32, #tpu.memory_space<vmem>>, vector<1x1x2x128xf32>
    %15 = vector.shape_cast %14 : vector<1x1x2x128xf32> to vector<2x128xf32>
    %c0_7 = arith.constant 0 : index
    %c1 = arith.constant 1 : index
    %c0_8 = arith.constant 0 : index
    %c0_9 = arith.constant 0 : index
    %16 = vector.load %arg2[%c0_7, %c1, %c0_8, %c0_9] : memref<1x4x2x128xf32, #tpu.memory_space<vmem>>, vector<1x1x2x128xf32>
    %17 = vector.shape_cast %16 : vector<1x1x2x128xf32> to vector<2x128xf32>
    %18 = arith.maximumf %15, %17 : vector<2x128xf32>
    %c0_10 = arith.constant 0 : index
    %c2 = arith.constant 2 : index
    %c0_11 = arith.constant 0 : index
    %c0_12 = arith.constant 0 : index
    %19 = vector.load %arg2[%c0_10, %c2, %c0_11, %c0_12] : memref<1x4x2x128xf32, #tpu.memory_space<vmem>>, vector<1x1x2x128xf32>
    %20 = vector.shape_cast %19 : vector<1x1x2x128xf32> to vector<2x128xf32>
    %21 = arith.maximumf %18, %20 : vector<2x128xf32>
    %c0_13 = arith.constant 0 : index
    %c3 = arith.constant 3 : index
    %c0_14 = arith.constant 0 : index
    %c0_15 = arith.constant 0 : index
    %22 = vector.load %arg2[%c0_13, %c3, %c0_14, %c0_15] : memref<1x4x2x128xf32, #tpu.memory_space<vmem>>, vector<1x1x2x128xf32>
    %23 = vector.shape_cast %22 : vector<1x1x2x128xf32> to vector<2x128xf32>
    %24 = arith.maximumf %21, %23 : vector<2x128xf32>
    %cst_16 = arith.constant 0.000000e+00 : f32
    %25 = vector.broadcast %cst_16 : f32 to vector<2x128xf32>
    %cst_17 = arith.constant 0.000000e+00 : f32
    %26 = vector.broadcast %cst_17 : f32 to vector<2x128xf32>
    %cst_18 = arith.constant 0.000000e+00 : f32
    %27 = vector.broadcast %cst_18 : f32 to vector<2x128xf32>
    %c0_19 = arith.constant 0 : index
    %c0_20 = arith.constant 0 : index
    %c0_21 = arith.constant 0 : index
    %c0_22 = arith.constant 0 : index
    %28 = vector.load %arg2[%c0_19, %c0_20, %c0_21, %c0_22] : memref<1x4x2x128xf32, #tpu.memory_space<vmem>>, vector<1x1x2x128xf32>
    %29 = vector.shape_cast %28 : vector<1x1x2x128xf32> to vector<2x128xf32>
    %30 = arith.subf %29, %24 : vector<2x128xf32>
    %31 = math.exp %30 : vector<2x128xf32>
    %32 = arith.addf %25, %31 : vector<2x128xf32>
    %33 = arith.addf %26, %29 : vector<2x128xf32>
    %c0_i32_23 = arith.constant 0 : i32
    %34 = vector.broadcast %c0_i32_23 : i32 to vector<2x128xi32>
    %35 = arith.cmpi eq, %4, %34 : vector<2x128xi32>
    %36 = arith.select %35, %29, %27 : vector<2x128xi1>, vector<2x128xf32>
    %c0_24 = arith.constant 0 : index
    %c1_25 = arith.constant 1 : index
    %c0_26 = arith.constant 0 : index
    %c0_27 = arith.constant 0 : index
    %37 = vector.load %arg2[%c0_24, %c1_25, %c0_26, %c0_27] : memref<1x4x2x128xf32, #tpu.memory_space<vmem>>, vector<1x1x2x128xf32>
    %38 = vector.shape_cast %37 : vector<1x1x2x128xf32> to vector<2x128xf32>
    %39 = arith.subf %38, %24 : vector<2x128xf32>
    %40 = math.exp %39 : vector<2x128xf32>
    %41 = arith.addf %32, %40 : vector<2x128xf32>
    %42 = arith.addf %33, %38 : vector<2x128xf32>
    %c1_i32 = arith.constant 1 : i32
    %43 = vector.broadcast %c1_i32 : i32 to vector<2x128xi32>
    %44 = arith.cmpi eq, %4, %43 : vector<2x128xi32>
    %45 = arith.select %44, %38, %36 : vector<2x128xi1>, vector<2x128xf32>
    %c0_28 = arith.constant 0 : index
    %c2_29 = arith.constant 2 : index
    %c0_30 = arith.constant 0 : index
    %c0_31 = arith.constant 0 : index
    %46 = vector.load %arg2[%c0_28, %c2_29, %c0_30, %c0_31] : memref<1x4x2x128xf32, #tpu.memory_space<vmem>>, vector<1x1x2x128xf32>
    %47 = vector.shape_cast %46 : vector<1x1x2x128xf32> to vector<2x128xf32>
    %48 = arith.subf %47, %24 : vector<2x128xf32>
    %49 = math.exp %48 : vector<2x128xf32>
    %50 = arith.addf %41, %49 : vector<2x128xf32>
    %51 = arith.addf %42, %47 : vector<2x128xf32>
    %c2_i32_32 = arith.constant 2 : i32
    %52 = vector.broadcast %c2_i32_32 : i32 to vector<2x128xi32>
    %53 = arith.cmpi eq, %4, %52 : vector<2x128xi32>
    %54 = arith.select %53, %47, %45 : vector<2x128xi1>, vector<2x128xf32>
    %c0_33 = arith.constant 0 : index
    %c3_34 = arith.constant 3 : index
    %c0_35 = arith.constant 0 : index
    %c0_36 = arith.constant 0 : index
    %55 = vector.load %arg2[%c0_33, %c3_34, %c0_35, %c0_36] : memref<1x4x2x128xf32, #tpu.memory_space<vmem>>, vector<1x1x2x128xf32>
    %56 = vector.shape_cast %55 : vector<1x1x2x128xf32> to vector<2x128xf32>
    %57 = arith.subf %56, %24 : vector<2x128xf32>
    %58 = math.exp %57 : vector<2x128xf32>
    %59 = arith.addf %50, %58 : vector<2x128xf32>
    %60 = arith.addf %51, %56 : vector<2x128xf32>
    %c3_i32 = arith.constant 3 : i32
    %61 = vector.broadcast %c3_i32 : i32 to vector<2x128xi32>
    %62 = arith.cmpi eq, %4, %61 : vector<2x128xi32>
    %63 = arith.select %62, %56, %54 : vector<2x128xi1>, vector<2x128xf32>
    %64 = math.log %59 : vector<2x128xf32>
    %65 = arith.addf %64, %24 : vector<2x128xf32>
    %cst_37 = arith.constant 0.899999976 : f32
    %66 = vector.broadcast %cst_37 : f32 to vector<2x128xf32>
    %67 = arith.mulf %66, %63 : vector<2x128xf32>
    %68 = arith.subf %65, %67 : vector<2x128xf32>
    %cst_38 = arith.constant 2.500000e-02 : f32
    %69 = vector.broadcast %cst_38 : f32 to vector<2x128xf32>
    %70 = arith.mulf %69, %60 : vector<2x128xf32>
    %71 = arith.subf %68, %70 : vector<2x128xf32>
    %cst_39 = arith.constant 0.000000e+00 : f32
    %72 = vector.broadcast %cst_39 : f32 to vector<2x128xf32>
    %73 = arith.select %13, %71, %72 : vector<2x128xi1>, vector<2x128xf32>
    %74 = vector.shape_cast %73 : vector<2x128xf32> to vector<1x2x128xf32>
    %cst_40 = arith.constant dense<0.000000e+00> : vector<2x128xf32>
    %75 = vector.multi_reduction <add>, %74, %cst_40 [0] : vector<1x2x128xf32> to vector<2x128xf32>
    %76 = arith.addf %1, %75 : vector<2x128xf32>
    %c0_41 = arith.constant 0 : index
    %c0_42 = arith.constant 0 : index
    %c0_43 = arith.constant 0 : index
    %c0_44 = arith.constant 0 : index
    %77 = vector.load %arg4[%c0_41, %c0_42, %c0_43, %c0_44] : memref<1x1x2x128xf32, #tpu.memory_space<vmem>>, vector<1x1x2x128xf32>
    %78 = vector.shape_cast %77 : vector<1x1x2x128xf32> to vector<2x128xf32>
    %79 = vector.shape_cast %76 : vector<2x128xf32> to vector<1x1x2x128xf32>
    tpu.vector_store %arg4[%c0_41, %c0_42, %c0_43, %c0_44], %79 {strides = array<i32>} : memref<1x1x2x128xf32, #tpu.memory_space<vmem>>, vector<1x1x2x128xf32>,
    return
  }
  func.func @transform_0(%arg0: i32, %arg1: i32) -> (i32, i32, i32, i32) {
    %c0_i32 = arith.constant 0 : i32
    %c0_i32_0 = arith.constant 0 : i32
    %c0_i32_1 = arith.constant 0 : i32
    return %arg0, %c0_i32, %arg1, %c0_i32_0 : i32, i32, i32, i32
  }
  func.func @transform_1(%arg0: i32, %arg1: i32) -> (i32, i32, i32) {
    %c0_i32 = arith.constant 0 : i32
    %c0_i32_0 = arith.constant 0 : i32
    return %arg0, %arg1, %c0_i32 : i32, i32, i32
  }
  func.func @transform_2(%arg0: i32, %arg1: i32) -> (i32, i32, i32, i32) {
    %c0_i32 = arith.constant 0 : i32
    %c0_i32_0 = arith.constant 0 : i32
    %c0_i32_1 = arith.constant 0 : i32
    return %arg0, %arg1, %c0_i32, %c0_i32_0 : i32, i32, i32, i32
  }
}

</mosaic_0001>

<bundles_post_ra>
// kernel: tpu_custom_call.1
= control target key start
LH: loop header
LB: loop body
LE: loop exit
PB: predicated region body
PF: predicated region fallthrough
CT: control target
= control target key end

     0   :  { %7 = vsyncpa [#allocation3], 0  ;;  %s797_s0 = inlined_call_operand.hbm [shape: f32[2,4,2,128], index: 0, kind: input, shape index: {}]   ;;  %s798_s1 = inlined_call_operand.hbm [shape: s16[2,2,128], index: 1, kind: input, shape index: {}]   ;;  %s799_s2 = inlined_call_operand.hbm [shape: f32[2,1,2,128], index: 2, kind: output, shape index: {}]  }
   0x1   :  { %9 = vsyncpa [#allocation3 + $0x1], 0 }
   0x2   :  { %10 = vsyncpa [#allocation6], 0 }
   0x3   :  { %12 = vsyncpa [#allocation6 + $0x1], 0 }
   0x4   :  { %13 = vsyncpa [#allocation4], 0 }
   0x5   :  { %15 = vsyncpa [#allocation4 + $0x1], 0  ;;  %s658_s9 = smov 0   ;;  %s660_s10 = smov 0  }
   0x6   :  { %s662_s11 = smov 0   ;;  %s664_s12 = smov 0  }
   0x7   :  { %s666_s13 = smov 0   ;;  %s668_s14 = smov 0  }
   0x8 LB: > { %s396_s15 = sadd.s32 4294967295, %s639_s14   ;;  %s397_s16 = sadd.s32 4294967294, %s639_s14   ;;  %s639_s14 = sphi %s668_s14, %s21_s14   ;;  %s635_s13 = sphi %s666_s13, %s809_s13   ;;  %s631_s12 = sphi %s664_s12, %s808_s12   ;;  %s627_s11 = sphi %s662_s11, %s807_s11   ;;  %s623_s10 = sphi %s660_s10, %s806_s10   ;;  %s619_s9 = sphi %s658_s9, %s805_s9  }
   0x9   : > { %s33_s17 = sadd.s32 1, %s635_s13  ;;  %s42_s18 = sadd.s32 1, %s627_s11 }
   0xa   : > { %p35_p0 = scmp.ge.s32.totalorder %s33_s17, 2  ;;  %p49_p1 = scmp.ne.s32.totalorder %s627_s11, %s623_s10 }
   0xb   : > { %p50_p2 = scmp.eq.s32.totalorder %s639_s14, 0  ;;  %p55_p3 = scmp.ne.s32.totalorder %s623_s10, %s619_s9 }
   0xc   : > { %s811_s17 = smov (%p35_p0, %s33_s17), 0  ;;  %p56_p5 = scmp.eq.s32.totalorder %s396_s15, 0 }
   0xd   : > { %p699_p4 = por %p50_p2, %p49_p1  ;;  %s37_s20 = ssub.s32 %s635_s13, %s811_s17 }
   0xe   : > { %p109_p6 = scmp.eq.s32.totalorder %s396_s15, 1  ;;  %p40_p7 = scmp.eq.s32.totalorder %s37_s20, 0 }
   0xf   : > { %p705_p8 = por %p56_p5, %p55_p3  ;;  %p115_p10 = scmp.eq.s32.totalorder %s397_s16, 1 }
  0x10   : > { %p709_p9 = por %p109_p6, %p49_p1  ;;  %p399_p12 = scmp.ge.s32.totalorder %s639_s14, 2 }
  0x11   : > { %s714_s23 = scalar_select %p40_p7, %s627_s11, %s42_s18  }
  0x12   : > { %p716_p11 = por %p115_p10, %p55_p3  ;;  %p431_p13 = scmp.lt.s32.totalorder %s639_s14, 2 }
  0x13   : > { %s135_s25 = sand.u32 1, %s627_s11   ;;  %s413_s27 = sshll.u32 %s635_s13, 3 }
  0x14   : > { %s400_s26 = sshll.u32 %s135_s25, 3  ;;  %s145_s30 = scalar_lea.hbm %s797_s0, %s413_s27 }
  0x15   : > { %s139_s3 = scalar_lea.vmem [#allocation2], %s400_s26  ;;  %s146_s5 = sshll.u32 %s145_s30, 4  ;;  %s147_s5 = int_to_ptr.hbm [resolvable:$true] %s146_s5 }
  0x16   : > { %s148_s4 = sshll.u32 %s139_s3, 4  ;;  %p729_p0 = pnand %p431_p13, %p699_p4  ;;  %s149_s4 = int_to_ptr.vmem [resolvable:$true] %s148_s4 }
  0x17   : > { %p403_p1 = scmp.ge.s32.totalorder %s639_s14, 1  ;;  %s136_s7 = scalar_lea.sflag [#allocation3], %s135_s25 }
  0x18   : > { %s641_s8 = smov 32   ;;  %s642_s15 = smov 2  }
  0x19   : > { %423 = dma.hbm_to_vmem [thread:$0]  (!%p729_p0), %s147_s5, 128, %s149_s4, %s136_s7, %s641_s8, %s641_s8, %s642_s15  }
  0x1a   : > { %p174_p2 = scmp.lt.s32.totalorder %s639_s14, 3  ;;  %s165_s20 = scalar_lea.hbm %s798_s1, %s635_s13 }
  0x1b   : > { %s167_s26 = sshll.u32 %s165_s20, 4  ;;  %s161_s19 = scalar_lea.vmem [#allocation5], %s135_s25  ;;  %s168_s26 = int_to_ptr.hbm [resolvable:$true] %s167_s26 }
  0x1c   : > { %p175_p3 = pnand %p403_p1, %p174_p2  ;;  %s169_s27 = sshll.u32 %s161_s19, 4  ;;  %s170_s27 = int_to_ptr.vmem [resolvable:$true] %s169_s27 }
  0x1d   : > { %s159_s28 = scalar_lea.sflag [#allocation6], %s135_s25  ;;  %s744_s29 = sand.u32 (!%p175_p3), 1, %s623_s10  }
  0x1e   : > { %426 = dma.hbm_to_vmem [thread:$0]  (!%p729_p0), %s168_s26, 16, %s170_s27, %s159_s28  }
  0x1f   : > { %178 = sbr.rel (%p175_p3) target bundleno = 83 (0x53), region = 28  ;;  %s404_s30 = sshll.u32 (!%p175_p3), %s744_s29, 3 }
  0x20   : > { %s181_s3 = scalar_lea.sflag (!%p175_p3), [#allocation3], %s744_s29  ;;  %s184_s4 = scalar_lea.vmem (!%p175_p3), [#allocation2], %s404_s30 }
  0x24   : > { %606 = dma.done.wait (%p705_p8), %s181_s3, 128  }
  0x25   : > { %608 = vsyncadd (%p705_p8), %s181_s3, 4294967168  ;;  %s191_s25 = scalar_lea.sflag [#allocation6], %s744_s29  ;;  %s193_s5 = scalar_lea.vmem [#allocation5], %s744_s29 }
  0x26   : > { %610 = dma.done.wait (%p705_p8), %s191_s25, 16  }
  0x27   : > { %612 = vsyncadd (%p705_p8), %s191_s25, 4294967280  ;;  %v229_v0 = vld [vmem:[%s184_s4] sm:$0x3]  ;;  %v406_v1 = vld [vmem:[%s184_s4 + $0x2] sm:$0x3]  ;;  %v222_v27 = vlaneseq  ;;  %s405_s21 = sshll.u32 %s744_s29, 1 }
  0x28   : > { %v232_v2 = vmax.f32 %v229_v0, %v406_v1  ;;  %v407_v3 = vld [vmem:[%s184_s4 + $0x4] sm:$0x3]  ;;  %v408_v4 = vld [vmem:[%s184_s4 + $0x6] sm:$0x3]  ;;  %v220_v14 = vld [vmem:[%s193_s5] sm:$0x1]  ;;  %v250_v24 = vadd.f32 %v406_v1, %v229_v0 }
  0x29   : > { %v221_v16 = vunpack.c.l.b16 %v220_v14  ;;  %v223_v31 = vshrl.u32 %v222_v27, 7  ;;  %s410_s6 = sshll.u32 %s631_s12, 1  ;;  %s218_s16 = scalar_lea.vmem [#allocation7], %s405_s21 }
  0x2a   : > { %v235_v5 = vmax.f32 %v232_v2, %v407_v3  ;;  %v257_v28 = vadd.f32 %v407_v3, %v250_v24  ;;  %s290_s15 = scalar_lea.hbm %s799_s2, %s410_s6  ;;  %s292_s18 = sshll.u32 %s218_s16, 4  ;;  %s293_s18 = int_to_ptr.vmem [resolvable:$true] %s292_s18 }
  0x2b   : > { %vm244_vm0 = vcmp.eq.s32.totalorder %v221_v16, 0  ;;  %vm251_vm1 = vcmp.eq.s32.totalorder %v221_v16, 1  ;;  %vm258_vm2 = vcmp.eq.s32.totalorder %v221_v16, 2  ;;  %vm265_vm3 = vcmp.eq.s32.totalorder %v221_v16, 3  ;;  %s294_s20 = sshll.u32 %s290_s15, 4  ;;  %s279_s12 = scalar_lea.sflag [#allocation4], %s744_s29  ;;  %s295_s20 = int_to_ptr.hbm [resolvable:$true] %s294_s20 }
  0x2c   : > { %v238_v6 = vmax.f32 %v235_v5, %v408_v4  ;;  %v245_v22 = vsel %vm244_vm0, %v229_v0, 0.0  ;;  %v264_v32 = vadd.f32 %v408_v4, %v257_v28  ;;  %vm226_vm4 = vcmp.lt.s32.totalorder %v223_v31, 2  ;;  %s567_s26 = sshra.s32 %s295_s20, 4  ;;  %s573_s30 = scalar_lea.hbm %s799_s2, 4  ;;  %s568_s26 = int_to_ptr.hbm [resolvable:$true] %s567_s26 }
  0x2d   : > { %v252_v25 = vsel %vm251_vm1, %v406_v1, %v245_v22  ;;  %vm227_vm5 = vcmp.ne.s32.totalorder %v221_v16, 255  ;;  %s569_s19 = scalar_lea.hbm %s568_s26, 2  ;;  %p574_p7 = scmp.lt.s32.totalorder %s568_s26, %s799_s2 }
  0x2e   : > { %v239_v7 = vsub.f32 %v229_v0, %v238_v6  ;;  %v246_v8 = vsub.f32 %v406_v1, %v238_v6  ;;  %v253_v9 = vsub.f32 %v407_v3, %v238_v6  ;;  %v260_v10 = vsub.f32 %v408_v4, %v238_v6  ;;  %vm228_vm6 = vmand %vm226_vm4, %vm227_vm5  ;;  %p570_p4 = scmp.ne.s32.totalorder %s568_s26, %s569_s19  ;;  %p575_p8 = scmp.lt.s32.totalorder %s573_s30, %s569_s19 }
  0x2f   : > { %v259_v29 = vsel %vm258_vm2, %v407_v3, %v252_v25  ;;  %v272_v37 = vmul.f32 0.025, %v264_v32 }
  0x30   : > { %v240_v11 = vmul.f32 1.442695, %v239_v7  ;;  %v247_v12 = vmul.f32 1.442695, %v246_v8  ;;  %v254_v13 = vmul.f32 1.442695, %v253_v9  ;;  %v266_v30 = vsel %vm265_vm3, %v408_v4, %v259_v29  ;;  %p571_p5 = pnand %p570_p4, %p709_p9  ;;  %p576_p10 = por %p575_p8, %p574_p7 }
  0x31   : > { %v261_v15 = vmul.f32 1.442695, %v260_v10  ;;  %v270_v35 = vmul.f32 0.9, %v266_v30 }
  0x32   : > { %483 = vpow2.f32 %v240_v11  ;;  %p572_p6 = pneg %p571_p5 }
  0x33   : > { %485 = vpow2.f32 %v247_v12 }
  0x34   : > { %487 = vpow2.f32 %v254_v13  ;;  %p577_p13 = pnand %p576_p10, %p572_p6 }
  0x35   : > { %489 = vpow2.f32 %v261_v15 }
  0x38   : > { %v484_v17 = vpop.eup %483 }
  0x39   : > { %v486_v18 = vpop.eup %485 }
  0x3a   : > { %v488_v19 = vpop.eup %487  ;;  %v249_v20 = vadd.f32 %v486_v18, %v484_v17 }
  0x3b   : > { %v490_v21 = vpop.eup %489 }
  0x3c   : > { %v256_v23 = vadd.f32 %v488_v19, %v249_v20 }
  0x3e   : > { %v263_v26 = vadd.f32 %v490_v21, %v256_v23 }
  0x40   : > { %491 = vlog2.f32 %v263_v26 }
  0x46   : > { %v492_v33 = vpop.eup %491 }
  0x47   : > { %v268_v34 = vmul.f32 0.6931472, %v492_v33 }
  0x49   : > { %v269_v36 = vadd.f32 %v268_v34, %v238_v6 }
  0x4b   : > { %v271_v38 = vsub.f32 %v269_v36, %v270_v35 }
  0x4d   : > { %v273_v39 = vsub.f32 %v271_v38, %v272_v37 }
  0x4f   : > { %v274_v40 = vsel %vm228_vm6, %v273_v39, 0.0 }
  0x50   : > { %277 = vst [vmem:[%s218_s16] sm:$0x3] %v274_v40 }
  0x51   : > { %580 = shalt.err (!%p577_p13)
}
  0x52   : > { %418 = dma.vmem_to_hbm [thread:$0]  (%p709_p9), %s293_s18, 32, %s295_s20, %s279_s12  }
  0x53 PF: > { %s306_s29 = sand.u32 1, %s619_s9   ;;  %p428_p0 = pnand %p399_p12, %p716_p11 }
  0x54   : > { %s307_s25 = scalar_lea.sflag [#allocation4], %s306_s29 }
  0x55   : > { %p429_p1 = pneg %p428_p0 }
  0x57   : > { %614 = dma.done.wait (%p429_p1), %s307_s25, 32  }
  0x58   : > { %616 = vsyncadd (%p429_p1), %s307_s25, 4294967264  ;;  %s21_s14 = sadd.s32 1, %s639_s14   ;;  %s805_s9 = smov %s623_s10 }
  0x59   : > { %p18_p2 = scmp.ge.s32.totalorder %s21_s14, 4   ;;  %s806_s10 = smov %s627_s11 }
  0x5a   : > { %s807_s11 = smov %s714_s23  ;;  %s808_s12 = smov %s635_s13 }
  0x5b   : > { %s809_s13 = smov %s811_s17  ;;  %20 = sbr.rel (!%p18_p2) target bundleno = 8 (0x8), region = 89 }
  0x60   :  { %313 = vsyncpa [#allocation3], 1 }
  0x61   :  { %315 = vsyncpa [#allocation3 + $0x1], 1 }
  0x62   :  { %316 = vsyncpa [#allocation6], 1 }
  0x63   :  { %318 = vsyncpa [#allocation6 + $0x1], 1 }
  0x64   :  { %319 = vsyncpa [#allocation4], 1 }
  0x65   :  { %321 = vsyncpa [#allocation4 + $0x1], 1 }

</bundles_post_ra>
